<compile_context>
chip_gen: v6e
topology: v6e:2x2x1
jax: 0.10.0
libtpu: 0.0.40
codegen_flags: <defaults>
</compile_context>

<pallas_src>
import jax
import jax.numpy as jnp
from jax.experimental import pallas as pl
from jax.experimental.pallas import tpu as pltpu


# ----------------------------- kernels ------------------------------------- #

def linear_kernel(x_ref, w_ref, o_ref):
    # XW1 tile = X_tile @ W1   (bf16 x bf16 -> f32 accumulate -> bf16 out)
    o_ref[...] = jnp.dot(
        x_ref[...], w_ref[...], preferred_element_type=jnp.float32
    ).astype(o_ref.dtype)


def fused_agg_kernel(a_ref, xw1_ref, b1_ref, w2_ref, b2_ref, o_ref,
                     a_vmem, hw2_vmem):
    # grid = (pass, row_tile).  A crosses HBM once (streamed during pass 0 and
    # kept in VMEM); H1@W2 stays in a VMEM scratch between the two passes.
    p = pl.program_id(0)
    i = pl.program_id(1)
    tm = o_ref.shape[0]
    row0 = pl.multiple_of(i * tm, tm)

    @pl.when(p == 0)
    def _():
        # layer 1: A_tile @ XW1 + b1 -> ReLU -> (.) @ W2, stashed in VMEM.
        a_tile = a_ref[...]                       # pipelined row-slab DMA from HBM
        a_vmem[pl.ds(row0, tm), :] = a_tile       # keep for pass 1 (single HBM read)
        z1 = jnp.dot(a_tile, xw1_ref[...], preferred_element_type=jnp.float32)
        h1 = jnp.maximum(z1 + b1_ref[...], 0.0).astype(jnp.bfloat16)
        hw2_vmem[pl.ds(row0, tm), :] = jnp.dot(
            h1, w2_ref[...], preferred_element_type=jnp.float32
        ).astype(hw2_vmem.dtype)
        o_ref[...] = jnp.zeros_like(o_ref)        # placeholder; overwritten in pass 1

    @pl.when(p == 1)
    def _():
        # layer 2: A_tile @ (H1 W2) + b2 -> masked row-wise log_softmax.
        a_tile = a_vmem[pl.ds(row0, tm), :]
        z = jnp.dot(a_tile, hw2_vmem[...], preferred_element_type=jnp.float32)
        z = z + b2_ref[...]                       # padded lanes carry -1e30 -> masked
        m = jnp.max(z, axis=1, keepdims=True)
        zs = z - m
        lse = jnp.log(jnp.sum(jnp.exp(zs), axis=1, keepdims=True))
        o_ref[...] = (zs - lse).astype(o_ref.dtype)


def agg1_kernel(a_ref, xw1_ref, b1_ref, w2_ref, o_ref):
    # (streamed fallback) layer 1: A_tile @ XW1 + b1 -> ReLU -> (.) @ W2
    z1 = jnp.dot(a_ref[...], xw1_ref[...], preferred_element_type=jnp.float32)
    h1 = jnp.maximum(z1 + b1_ref[...], 0.0).astype(jnp.bfloat16)
    o_ref[...] = jnp.dot(
        h1, w2_ref[...], preferred_element_type=jnp.float32
    ).astype(o_ref.dtype)


def agg2_kernel(a_ref, hw2_ref, b2_ref, o_ref):
    # (streamed fallback) layer 2: A_tile @ (H1 W2) + b2 -> masked log_softmax
    z = jnp.dot(a_ref[...], hw2_ref[...], preferred_element_type=jnp.float32)
    z = z + b2_ref[...]
    m = jnp.max(z, axis=1, keepdims=True)
    zs = z - m
    lse = jnp.log(jnp.sum(jnp.exp(zs), axis=1, keepdims=True))
    o_ref[...] = (zs - lse).astype(o_ref.dtype)


# ----------------------------- wrapper -------------------------------------- #

def _round_up(x, m):
    return ((x + m - 1) // m) * m


def build_normalized_adjacency_padded(edge_index, num_nodes, n_pad):
    """D^{-1/2} (A + I) D^{-1/2}, built directly as a zero-padded bf16
    (n_pad, n_pad) matrix (GCNConv default normalization).  Duplicate edges
    deduplicate to weight 1; the diagonal is set (not added) so pre-existing
    self-loops are not double counted.  Padded rows/cols stay exactly zero."""
    src, dst = edge_index
    diag = jnp.arange(num_nodes)
    one = jnp.ones((), jnp.bfloat16)
    adj = (jnp.zeros((n_pad, n_pad), jnp.bfloat16)
           .at[src, dst].set(one)
           .at[diag, diag].set(one))
    deg = jnp.sum(adj, axis=1, dtype=jnp.float32)              # padded rows: 0
    d_inv_sqrt = jnp.where(deg > 0, jax.lax.rsqrt(jnp.maximum(deg, 1.0)), 0.0)
    # Scatter the normalized values straight into the padded bf16 buffer.
    edge_val = (d_inv_sqrt[src] * d_inv_sqrt[dst]).astype(jnp.bfloat16)
    diag_val = (d_inv_sqrt[:num_nodes] * d_inv_sqrt[:num_nodes]).astype(jnp.bfloat16)
    a_bf = (jnp.zeros((n_pad, n_pad), jnp.bfloat16)
            .at[src, dst].set(edge_val)
            .at[diag, diag].set(diag_val))
    return a_bf


def gnn_forward(x, edge_index, w1, b1, w2, b2, *, max_resident_a_bytes=32 * 2**20):
    n, f_in = x.shape
    h = w1.shape[1]
    c = w2.shape[1]

    # Lane-dense padded feature dims (no masked partial stores on 7/16-wide outs).
    f_pad = _round_up(max(f_in, 128), 128)
    h_pad = _round_up(max(h, 128), 128)
    c_pad = _round_up(max(c, 128), 128)

    # Row-tile / path selection.  Fused (A VMEM-resident) path whenever bf16 A
    # fits a conservative VMEM budget (safe on v7x's 64 MiB VMEM per core);
    # otherwise stream A twice with bigger 512-row slabs.
    tm = 256 if n >= 512 else 128
    n_pad = _round_up(n, tm)
    fused = (2 * n_pad * n_pad) <= max_resident_a_bytes
    if not fused:
        tm = 512 if n >= 1024 else tm
        n_pad = _round_up(n, tm)

    # Padded bf16 operands.  Zero-padded rows/cols are inert: padded A columns
    # are 0 and padded W/b lanes are 0, so real rows are never contaminated.
    a_bf = build_normalized_adjacency_padded(edge_index, n, n_pad)
    x_bf = jnp.zeros((n_pad, f_pad), jnp.bfloat16).at[:n, :f_in].set(
        x.astype(jnp.bfloat16))
    w1_bf = jnp.zeros((f_pad, h_pad), jnp.bfloat16).at[:f_in, :h].set(
        w1.astype(jnp.bfloat16))
    w2_bf = jnp.zeros((h_pad, c_pad), jnp.bfloat16).at[:h, :c].set(
        w2.astype(jnp.bfloat16))
    b1_f = jnp.zeros((1, h_pad), jnp.float32).at[:, :h].set(b1.astype(jnp.float32))
    # Padded logit lanes get -1e30 so they drop out of the log_softmax.
    b2_f = jnp.full((1, c_pad), -1e30, jnp.float32).at[:, :c].set(
        b2.astype(jnp.float32))

    grid = (n_pad // tm,)
    vmem_limit = 48 * 2**20

    # ---- kernel 1: XW1 = X @ W1  (row-tiled over X rows, W1 resident) -------- #
    xw1 = pl.pallas_call(
        linear_kernel,
        out_shape=jax.ShapeDtypeStruct((n_pad, h_pad), jnp.bfloat16),
        grid=grid,
        in_specs=[
            pl.BlockSpec((tm, f_pad), lambda i: (i, 0)),
            pl.BlockSpec((f_pad, h_pad), lambda i: (0, 0)),
        ],
        out_specs=pl.BlockSpec((tm, h_pad), lambda i: (i, 0)),
        compiler_params=pltpu.CompilerParams(
            dimension_semantics=("parallel",), vmem_limit_bytes=vmem_limit),
    )(x_bf, w1_bf)

    if fused:
        # ---- fused aggregation: A read from HBM exactly once ----------------- #
        out = pl.pallas_call(
            fused_agg_kernel,
            out_shape=jax.ShapeDtypeStruct((n_pad, c_pad), jnp.float32),
            grid=(2, n_pad // tm),
            in_specs=[
                # pass 0 streams row slabs (i, 0); pass 1 pins block (0, 0) (unused)
                pl.BlockSpec((tm, n_pad), lambda p, i: (i * (1 - p), 0)),
                pl.BlockSpec((n_pad, h_pad), lambda p, i: (0, 0)),   # XW1 resident
                pl.BlockSpec((1, h_pad), lambda p, i: (0, 0)),       # b1
                pl.BlockSpec((h_pad, c_pad), lambda p, i: (0, 0)),   # W2 resident
                pl.BlockSpec((1, c_pad), lambda p, i: (0, 0)),       # b2 (masked lanes)
            ],
            out_specs=pl.BlockSpec((tm, c_pad), lambda p, i: (i, 0)),
            scratch_shapes=[
                pltpu.VMEM((n_pad, n_pad), jnp.bfloat16),   # A resident across passes
                pltpu.VMEM((n_pad, c_pad), jnp.bfloat16),   # H1 @ W2 between passes
            ],
            compiler_params=pltpu.CompilerParams(
                # pass 1 depends on all of pass 0 via the shared scratch: run the
                # fused grid sequentially on one core.
                dimension_semantics=("arbitrary", "arbitrary"),
                vmem_limit_bytes=vmem_limit),
        )(a_bf, xw1, b1_f, w2_bf, b2_f)
        return out[:n, :c]

    # ---- streamed fallback (large graphs): two row-tiled passes over A ------- #
    cparams = pltpu.CompilerParams(
        dimension_semantics=("parallel",), vmem_limit_bytes=vmem_limit)

    hw2 = pl.pallas_call(
        agg1_kernel,
        out_shape=jax.ShapeDtypeStruct((n_pad, c_pad), jnp.bfloat16),
        grid=grid,
        in_specs=[
            pl.BlockSpec((tm, n_pad), lambda i: (i, 0)),     # A row slab (streamed)
            pl.BlockSpec((n_pad, h_pad), lambda i: (0, 0)),  # XW1 resident
            pl.BlockSpec((1, h_pad), lambda i: (0, 0)),      # b1
            pl.BlockSpec((h_pad, c_pad), lambda i: (0, 0)),  # W2 resident
        ],
        out_specs=pl.BlockSpec((tm, c_pad), lambda i: (i, 0)),
        compiler_params=cparams,
    )(a_bf, xw1, b1_f, w2_bf)

    out = pl.pallas_call(
        agg2_kernel,
        out_shape=jax.ShapeDtypeStruct((n_pad, c_pad), jnp.float32),
        grid=grid,
        in_specs=[
            pl.BlockSpec((tm, n_pad), lambda i: (i, 0)),     # A row slab (streamed)
            pl.BlockSpec((n_pad, c_pad), lambda i: (0, 0)),  # H1W2 resident
            pl.BlockSpec((1, c_pad), lambda i: (0, 0)),      # b2 (masked lanes)
        ],
        out_specs=pl.BlockSpec((tm, c_pad), lambda i: (i, 0)),
        compiler_params=cparams,
    )(a_bf, hw2, b2_f)
    return out[:n, :c]


# ------------------------------- test --------------------------------------- #

if __name__ == "__main__":
    # Small synthetic shapes consistent with the module (Cora is just larger:
    # N=2708, F_in=1433, H=16, C=7).
    num_nodes = 32
    input_dim = 64
    hidden_dim = 16
    output_dim = 7

    key = jax.random.PRNGKey(0)
    k_x, k_e, k_w1, k_w2 = jax.random.split(key, 4)

    x = jax.random.normal(k_x, (num_nodes, input_dim), jnp.float32)

    # deterministic synthetic (symmetric) edge_index, shape [2, E]
    src = jax.random.randint(k_e, (48,), 0, num_nodes)
    dst = jnp.roll(src, 11)
    edge_index = jnp.stack(
        [jnp.concatenate([src, dst]), jnp.concatenate([dst, src])], axis=0
    )

    # GCNConv parameters (glorot weights, zero biases like PyG default)
    def glorot(k, shape):
        fan_in, fan_out = shape
        lim = jnp.sqrt(6.0 / (fan_in + fan_out))
        return jax.random.uniform(k, shape, jnp.float32, -lim, lim)

    w1 = glorot(k_w1, (input_dim, hidden_dim))
    b1 = jnp.zeros((1, hidden_dim), jnp.float32)
    w2 = glorot(k_w2, (hidden_dim, output_dim))
    b2 = jnp.zeros((1, output_dim), jnp.float32)

    # Reference in plain JAX mirroring the kernel's bf16 streams / f32 accum.
    bf = jnp.bfloat16
    a32 = build_normalized_adjacency_padded(
        edge_index, num_nodes, _round_up(num_nodes, 128)
    )[:num_nodes, :num_nodes].astype(jnp.float32)
    x32 = x.astype(bf).astype(jnp.float32)
    w1_32 = w1.astype(bf).astype(jnp.float32)
    w2_32 = w2.astype(bf).astype(jnp.float32)
    xw1_r = (x32 @ w1_32).astype(bf).astype(jnp.float32)
    h1_r = jnp.maximum(a32 @ xw1_r + b1, 0.0).astype(bf).astype(jnp.float32)
    hw2_r = (h1_r @ w2_32).astype(bf).astype(jnp.float32)
    z_r = a32 @ hw2_r + b2
    ref = jax.nn.log_softmax(z_r, axis=1)

    # Fused (A VMEM-resident, single HBM read of A) path.
    out_fused = jax.block_until_ready(gnn_forward(x, edge_index, w1, b1, w2, b2))
    assert out_fused.shape == ref.shape, "shape mismatch vs reference (fused)"
    assert jnp.allclose(out_fused, ref, atol=2e-3, rtol=2e-3), "fused path mismatch"

    # Streamed fallback path (forced by disabling the resident-A budget).
    out_streamed = jax.block_until_ready(
        gnn_forward(x, edge_index, w1, b1, w2, b2, max_resident_a_bytes=0))
    assert out_streamed.shape == ref.shape, "shape mismatch vs reference (streamed)"
    assert jnp.allclose(out_streamed, ref, atol=2e-3, rtol=2e-3), "streamed path mismatch"

    print("KERNEL_OK")
</pallas_src>

<mosaic_0001>
module attributes {stable_mosaic.version = 11 : i64} {
  func.func @linear_kernel(%arg0: i32, %arg1: memref<128x128xbf16, #tpu.memory_space<vmem>>, %arg2: memref<128x128xbf16, #tpu.memory_space<vmem>>, %arg3: memref<128x128xbf16, #tpu.memory_space<vmem>>) attributes {dimension_semantics = [#tpu.dimension_semantics<parallel>], iteration_bounds = array<i64: 1>, scalar_prefetch = 0 : i64, scratch_operands = 0 : i64, tpu.core_type = #tpu.core_type<tc>, window_params = [{transform_indices = @transform_0, window_bounds = array<i64: 128, 128>}, {pipeline_mode = #tpu.pipeline_mode<synchronous>, transform_indices = @transform_1, window_bounds = array<i64: 128, 128>}, {transform_indices = @transform_2, window_bounds = array<i64: 128, 128>}]} {
    %c0 = arith.constant 0 : index
    %c0_0 = arith.constant 0 : index
    %0 = vector.load %arg1[%c0, %c0_0] : memref<128x128xbf16, #tpu.memory_space<vmem>>, vector<128x128xbf16>
    %c0_1 = arith.constant 0 : index
    %c0_2 = arith.constant 0 : index
    %1 = vector.load %arg2[%c0_1, %c0_2] : memref<128x128xbf16, #tpu.memory_space<vmem>>, vector<128x128xbf16>
    %cst = arith.constant dense<0.000000e+00> : vector<128x128xf32>
    %2 = tpu.matmul %0, %1, %cst {dimension_numbers = #tpu.dot_dimension_numbers<[1], [0], [0], [1], [0, 0, 1, 1], [], []>} : vector<128x128xbf16>, vector<128x128xbf16>, vector<128x128xf32> -> vector<128x128xf32>
    %3 = arith.truncf %2 : vector<128x128xf32> to vector<128x128xbf16>
    %c0_3 = arith.constant 0 : index
    %c0_4 = arith.constant 0 : index
    %4 = vector.load %arg3[%c0_3, %c0_4] : memref<128x128xbf16, #tpu.memory_space<vmem>>, vector<128x128xbf16>
    tpu.vector_store %arg3[%c0_3, %c0_4], %3 {strides = array<i32>} : memref<128x128xbf16, #tpu.memory_space<vmem>>, vector<128x128xbf16>,
    return
  }
  func.func @transform_0(%arg0: i32) -> (i32, i32) {
    %c0_i32 = arith.constant 0 : i32
    %c0_i32_0 = arith.constant 0 : i32
    return %arg0, %c0_i32 : i32, i32
  }
  func.func @transform_1(%arg0: i32) -> (i32, i32) {
    %c0_i32 = arith.constant 0 : i32
    %c0_i32_0 = arith.constant 0 : i32
    %c0_i32_1 = arith.constant 0 : i32
    return %c0_i32, %c0_i32_0 : i32, i32
  }
  func.func @transform_2(%arg0: i32) -> (i32, i32) {
    %c0_i32 = arith.constant 0 : i32
    %c0_i32_0 = arith.constant 0 : i32
    return %arg0, %c0_i32 : i32, i32
  }
}

</mosaic_0001>

<bundles_post_ra>
// kernel: tpu_custom_call.1
= control target key start
LH: loop header
LB: loop body
LE: loop exit
PB: predicated region body
PF: predicated region fallthrough
CT: control target
= control target key end

     0   :  { %7 = vsyncpa [#allocation3], 0  ;;  %s648_s0 = inlined_call_operand.hbm [shape: bf16[128,128], index: 0, kind: input, shape index: {}]   ;;  %s649_s1 = inlined_call_operand.hbm [shape: bf16[128,128], index: 1, kind: input, shape index: {}]   ;;  %s650_s2 = inlined_call_operand.hbm [shape: bf16[128,128], index: 2, kind: output, shape index: {}]  }
   0x1   :  { %8 = vsyncpa [#allocation6], 0 }
   0x2   :  { %9 = vsyncpa [#allocation4], 0  ;;  %s610_s9 = smov [#allocation2]  }
   0x3   :  { %s15_s10 = sshll.u32 %s610_s9, 4  ;;  %s16_s10 = int_to_ptr.vmem [resolvable:$true] %s15_s10 }
   0x4   :  { %s552_s11 = scalar_lea.vmem %s16_s10, 1024  ;;  %p557_p1 = scmp.lt.s32.totalorder %s16_s10, %s16_s10 }
   0x5   :  { %p553_p0 = scmp.ne.s32.totalorder %s16_s10, %s552_s11  ;;  %p558_p2 = scmp.lt.s32.totalorder %s552_s11, %s552_s11 }
   0x7   :  { %p559_p3 = por %p558_p2, %p557_p1 }
   0x9   :  { %p560_p4 = pnand %p559_p3, %p553_p0 }
   0xb   :  { %563 = shalt.err (!%p560_p4)
}
   0xc   :  { %s611_s12 = smov 64   ;;  %s612_s13 = smov 4  }
   0xd   :  { %21 = dma.hbm_to_vmem [thread:$0]  %s648_s0, 1024, %s16_s10, [#allocation3], %s611_s12, %s611_s12, %s612_s13  }
   0xe   :  { %s613_s16 = smov [#allocation5]  }
   0xf   :  { %s27_s17 = sshll.u32 %s613_s16, 4  ;;  %s28_s17 = int_to_ptr.vmem [resolvable:$true] %s27_s17 }
  0x10   :  { %s572_s18 = scalar_lea.vmem %s28_s17, 1024  ;;  %p577_p6 = scmp.lt.s32.totalorder %s28_s17, %s28_s17 }
  0x11   :  { %p573_p5 = scmp.ne.s32.totalorder %s28_s17, %s572_s18  ;;  %p578_p7 = scmp.lt.s32.totalorder %s572_s18, %s572_s18 }
  0x13   :  { %p579_p8 = por %p578_p7, %p577_p6 }
  0x15   :  { %p580_p9 = pnand %p579_p8, %p573_p5 }
  0x17   :  { %583 = shalt.err (!%p580_p9)
}
  0x18   :  { %33 = dma.hbm_to_vmem [thread:$0]  %s649_s1, 1024, %s28_s17, [#allocation6], %s611_s12, %s611_s12, %s612_s13  }
  0x19   :  { %604 = dma.done.wait [#allocation3], 1024  }
  0x1a   :  { %605 = vsyncadd [#allocation3], 4294966272 }
  0x1b   :  { %606 = dma.done.wait [#allocation6], 1024  }
  0x1c   :  { %607 = vsyncadd [#allocation6], 4294966272  ;;  %v528_v0 = vld [vmem:[#allocation5 + $0x38] sm:$0xff]   ;;  %v529_v1 = vld [vmem:[#allocation5 + $0x30] sm:$0xff]   ;;  %s614_s0 = smov [#allocation7]  }
  0x1d   :  { %475 = vmatprep.subr.bf16.mxu0 %v528_v0  ;;  %507 = vmatprep.subr.bf16.mxu1 %v528_v0  ;;  %v530_v2 = vld [vmem:[#allocation5 + $0x28] sm:$0xff]   ;;  %v531_v3 = vld [vmem:[#allocation5 + $0x20] sm:$0xff]   ;;  %v532_v6 = vld [vmem:[#allocation5 + $0x18] sm:$0xff]   ;;  %s351_s1 = sshll.u32 %s614_s0, 4  ;;  %s352_s1 = int_to_ptr.vmem [resolvable:$true] %s351_s1 }
  0x1e   :  { %476 = vmatpush3.bf16.msra.mxu0 %v528_v0  ;;  %515 = vmatpush3.bf16.msra.mxu1 %v528_v0  ;;  %v536_v4 = vld [vmem:[#allocation2] sm:$0xff]   ;;  %v533_v7 = vld [vmem:[#allocation5 + $0x10] sm:$0xff]   ;;  %v534_v8 = vld [vmem:[#allocation5 + $0x8] sm:$0xff]   ;;  %s584_s21 = scalar_lea.vmem %s352_s1, 1024  ;;  %p589_p11 = scmp.lt.s32.totalorder %s352_s1, %s352_s1 }
  0x1f   :  { %477 = vmatprep.subr.bf16.mxu0 %v529_v1  ;;  %508 = vmatprep.subr.bf16.mxu1 %v529_v1  ;;  %v537_v5 = vld [vmem:[#allocation2 + $0x20] sm:$0xff]   ;;  %v538_v10 = vld [vmem:[#allocation2 + $0x8] sm:$0xff]   ;;  %v540_v12 = vld [vmem:[#allocation2 + $0x10] sm:$0xff]   ;;  %p585_p10 = scmp.ne.s32.totalorder %s352_s1, %s584_s21  ;;  %p590_p12 = scmp.lt.s32.totalorder %s584_s21, %s584_s21 }
  0x20   :  { %491 = vmatprep.mubr.bf16.mxu0 %v536_v4  ;;  %499 = vmatprep.mubr.bf16.mxu1 %v537_v5  ;;  %v535_v9 = vld [vmem:[#allocation5] sm:$0xff]   ;;  %v539_v11 = vld [vmem:[#allocation2 + $0x28] sm:$0xff]   ;;  %v541_v13 = vld [vmem:[#allocation2 + $0x30] sm:$0xff]  }
  0x21   :  { %v542_v14 = vld [vmem:[#allocation2 + $0x18] sm:$0xff]   ;;  %p591_p13 = por %p590_p12, %p589_p11 }
  0x22   :  { %478 = vmatpush3.bf16.msra.mxu0 %v529_v1  ;;  %516 = vmatpush3.bf16.msra.mxu1 %v529_v1  ;;  %v543_v15 = vld [vmem:[#allocation2 + $0x38] sm:$0xff]  }
  0x23   :  { %479 = vmatprep.subr.bf16.mxu0 %v530_v2  ;;  %509 = vmatprep.subr.bf16.mxu1 %v530_v2  ;;  %p592_p0 = pnand %p591_p13, %p585_p10 }
  0x26   :  { %480 = vmatpush3.bf16.msra.mxu0 %v530_v2  ;;  %517 = vmatpush3.bf16.msra.mxu1 %v530_v2 }
  0x27   :  { %481 = vmatprep.subr.bf16.mxu0 %v531_v3  ;;  %510 = vmatprep.subr.bf16.mxu1 %v531_v3 }
  0x2a   :  { %482 = vmatpush3.bf16.msra.mxu0 %v531_v3  ;;  %518 = vmatpush3.bf16.msra.mxu1 %v531_v3 }
  0x2b   :  { %483 = vmatprep.subr.bf16.mxu0 %v532_v6  ;;  %511 = vmatprep.subr.bf16.mxu1 %v532_v6 }
  0x2e   :  { %484 = vmatpush3.bf16.msra.mxu0 %v532_v6  ;;  %519 = vmatpush3.bf16.msra.mxu1 %v532_v6 }
  0x2f   :  { %485 = vmatprep.subr.bf16.mxu0 %v533_v7  ;;  %512 = vmatprep.subr.bf16.mxu1 %v533_v7 }
  0x32   :  { %486 = vmatpush3.bf16.msra.mxu0 %v533_v7  ;;  %520 = vmatpush3.bf16.msra.mxu1 %v533_v7 }
  0x33   :  { %487 = vmatprep.subr.bf16.mxu0 %v534_v8  ;;  %513 = vmatprep.subr.bf16.mxu1 %v534_v8 }
  0x36   :  { %488 = vmatpush3.bf16.msra.mxu0 %v534_v8  ;;  %521 = vmatpush3.bf16.msra.mxu1 %v534_v8 }
  0x37   :  { %489 = vmatprep.subr.bf16.mxu0 %v535_v9  ;;  %514 = vmatprep.subr.bf16.mxu1 %v535_v9 }
  0x3a   :  { %490 = vmatpush3.bf16.msra.mxu0 %v535_v9  ;;  %522 = vmatpush3.bf16.msra.mxu1 %v535_v9 }
  0x3d   :  { %492 = vmatmul.mubr.bf16.vlgmr.msra.gmra.mxu0 %v538_v10  ;;  %500 = vmatmul.mubr.bf16.vlgmr.msra.gmra.mxu1 %v539_v11 }
  0x3e   :  { %495 = vmatprep.mubr.bf16.mxu0 %v540_v12  ;;  %503 = vmatprep.mubr.bf16.mxu1 %v541_v13 }
  0x45   :  { %496 = vmatmul.mubr.bf16.gmra.mxu0 %v542_v14  ;;  %504 = vmatmul.mubr.bf16.gmra.mxu1 %v543_v15 }
  0xfd   :  { %v493_v16 = vpop.f32.mrf.mxu0  ;;  %v501_v17 = vpop.f32.mrf.mxu1 }
  0xff   :  { %v203_v18 = vpop.f32.mrf.mxu0  ;;  %v235_v19 = vpop.f32.mrf.mxu1 }
 0x101   :  { %v494_v20 = vpop.f32.mrf.mxu0  ;;  %v502_v21 = vpop.f32.mrf.mxu1 }
 0x102   :  { %v420_v22 = vpack.c.bf16 %v494_v20, %v493_v16  ;;  %v440_v23 = vpack.c.bf16 %v502_v21, %v501_v17 }
 0x103   :  { %v206_v24 = vpop.f32.mrf.mxu0  ;;  %v238_v25 = vpop.f32.mrf.mxu1 }
 0x104   :  { %452 = vst [vmem:[#allocation7 + $0x8] sm:$0xff] %v420_v22   ;;  %456 = vst [vmem:[#allocation7 + $0x28] sm:$0xff] %v440_v23   ;;  %v415_v26 = vpack.c.bf16 %v206_v24, %v203_v18  ;;  %v435_v27 = vpack.c.bf16 %v238_v25, %v235_v19 }
 0x105   :  { %v497_v28 = vpop.f32.mrf.mxu0  ;;  %v505_v29 = vpop.f32.mrf.mxu1 }
 0x106   :  { %416 = vst [vmem:[#allocation7] sm:$0xff] %v415_v26   ;;  %455 = vst [vmem:[#allocation7 + $0x20] sm:$0xff] %v435_v27  }
 0x107   :  { %v219_v30 = vpop.f32.mrf.mxu0  ;;  %v251_v31 = vpop.f32.mrf.mxu1 }
 0x109   :  { %v498_v32 = vpop.f32.mrf.mxu0  ;;  %v506_v33 = vpop.f32.mrf.mxu1 }
 0x10a   :  { %v430_v34 = vpack.c.bf16 %v498_v32, %v497_v28  ;;  %v450_v35 = vpack.c.bf16 %v506_v33, %v505_v29 }
 0x10b   :  { %v222_v36 = vpop.f32.mrf.mxu0  ;;  %v254_v37 = vpop.f32.mrf.mxu1 }
 0x10c   :  { %454 = vst [vmem:[#allocation7 + $0x18] sm:$0xff] %v430_v34   ;;  %458 = vst [vmem:[#allocation7 + $0x38] sm:$0xff] %v450_v35   ;;  %v425_v38 = vpack.c.bf16 %v222_v36, %v219_v30  ;;  %v445_v39 = vpack.c.bf16 %v254_v37, %v251_v31 }
 0x10e   :  { %453 = vst [vmem:[#allocation7 + $0x10] sm:$0xff] %v425_v38   ;;  %457 = vst [vmem:[#allocation7 + $0x30] sm:$0xff] %v445_v39  }
 0x10f   :  { %595 = shalt.err (!%p592_p0)
}
 0x110   :  { %357 = dma.vmem_to_hbm [thread:$0]  %s352_s1, 1024, %s650_s2, [#allocation4], %s611_s12, %s611_s12, %s612_s13  }
 0x111   :  { %608 = dma.done.wait [#allocation4], 1024  }
 0x112   :  { %609 = vsyncadd [#allocation4], 4294966272 }
 0x113   :  { %361 = vsyncpa [#allocation3], 1 }
 0x114   :  { %362 = vsyncpa [#allocation6], 1 }
 0x115   :  { %363 = vsyncpa [#allocation4], 1 }

</bundles_post_ra>
